<compile_context>
chip_gen: v7x
topology: tpu7x:2x2x1
jax: 0.10.0
libtpu: 0.0.40
codegen_flags: <defaults>
</compile_context>

<pallas_src>
import jax
import jax.numpy as jnp
from jax.experimental import pallas as pl
from jax.experimental.pallas import tpu as pltpu

EPS = 1e-5


def _patch_bn_relu_pos_kernel(p_ref, w_ref, gb_ref, pos_ref, o_ref):
    # p_ref   : (B*P, K)  bf16 patch matrix
    # w_ref   : (K, E)    bf16 conv weight (flattened, transposed)
    # gb_ref  : (2, E)    f32  [gamma; beta]
    # pos_ref : (P, E)    f32  position encoding
    # o_ref   : (B*P, E)  f32  output
    y = jnp.dot(p_ref[...], w_ref[...], preferred_element_type=jnp.float32)

    # --- single-pass BatchNorm stats over rows (N*H*W), per channel ---
    n = y.shape[0]
    inv_n = 1.0 / n
    s = jnp.sum(y, axis=0, keepdims=True)
    sq = jnp.sum(y * y, axis=0, keepdims=True)
    mean = s * inv_n
    # Clamp: E[y^2] - E[y]^2 can go epsilon-negative from cancellation.
    var = jnp.maximum(sq * inv_n - mean * mean, 0.0)   # biased var (training)

    gamma = gb_ref[0:1, :]
    beta = gb_ref[1:2, :]
    scale = gamma * jax.lax.rsqrt(var + EPS)           # EUP rsqrt
    shift = beta - mean * scale

    yr = jnp.maximum(y * scale + shift, 0.0)           # folded affine + ReLU

    # --- add position encoding, broadcast over batch (pos is (P, E)) ---
    posv = pos_ref[...]
    P = pos_ref.shape[0]
    B = n // P
    for b in range(B):                                 # static; aligned stores
        o_ref[pl.ds(b * P, P), :] = yr[b * P:(b + 1) * P, :] + posv


def _forward_impl(x, conv_w, conv_b, bn_gamma, bn_beta, pos):
    """x: (B, 3, 64, 64) f32. Returns (B, 64, 384) f32.

    conv_b is accepted for signature fidelity but intentionally unused: under
    training-mode BatchNorm the per-channel bias is cancelled by the batch
    mean subtraction (exact up to f32 rounding).
    """
    del conv_b
    B, C, H, W = x.shape
    KH = KW = 8
    E = conv_w.shape[0]
    PH, PW = H // KH, W // KW
    P = PH * PW
    K = C * KH * KW                                    # 192

    assert (B * P) % 8 == 0 and P % 8 == 0 and E % 128 == 0

    # Patch extraction: one relayout, done in bf16 (half the relayout bytes).
    # Columns ordered (c, kh, kw) == flattened Conv2d weight layout.
    xp = x.astype(jnp.bfloat16).reshape(B, C, PH, KH, PW, KW)
    xp = jnp.transpose(xp, (0, 2, 4, 1, 3, 5))         # (B, PH, PW, C, KH, KW)
    patches = xp.reshape(B * P, K)                     # (B*P, K) bf16

    w_mat = conv_w.reshape(E, K).T.astype(jnp.bfloat16)  # (K, E) bf16
    gb = jnp.stack([bn_gamma, bn_beta], axis=0)        # (2, E) packed params
    pos2 = pos.reshape(P, E)                           # (P, E), NOT tiled over B

    # Single grid step: blocks are the full arrays (so K=192 / P=64 are legal
    # block dims), working set well under VMEM on v5e/v6e/v7x.
    out_flat = pl.pallas_call(
        _patch_bn_relu_pos_kernel,
        out_shape=jax.ShapeDtypeStruct((B * P, E), jnp.float32),
        grid=(1,),
        in_specs=[
            pl.BlockSpec((B * P, K), lambda i: (0, 0)),
            pl.BlockSpec((K, E), lambda i: (0, 0)),
            pl.BlockSpec((2, E), lambda i: (0, 0)),
            pl.BlockSpec((P, E), lambda i: (0, 0)),
        ],
        out_specs=pl.BlockSpec((B * P, E), lambda i: (0, 0)),
    )(patches, w_mat, gb, pos2)

    return out_flat.reshape(B, P, E)


# Single-dispatch forward: relayout + pallas_call fuse under one jit.
conv_patching_forward = jax.jit(_forward_impl)


def _reference(x, conv_w, conv_b, bn_gamma, bn_beta, pos):
    """Pure-JAX mirror of the PyTorch forward (training-mode BN, with bias)."""
    y = jax.lax.conv_general_dilated(
        x, conv_w, window_strides=(8, 8), padding="VALID",
        dimension_numbers=("NCHW", "OIHW", "NCHW"))
    y = y + conv_b.reshape(1, -1, 1, 1)
    mean = jnp.mean(y, axis=(0, 2, 3), keepdims=True)
    var = jnp.mean((y - mean) ** 2, axis=(0, 2, 3), keepdims=True)
    y = (y - mean) / jnp.sqrt(var + EPS)
    y = y * bn_gamma.reshape(1, -1, 1, 1) + bn_beta.reshape(1, -1, 1, 1)
    y = jnp.maximum(y, 0.0)
    B, E = y.shape[0], y.shape[1]
    out = jnp.transpose(y.reshape(B, E, -1), (0, 2, 1))
    return out + pos


if __name__ == "__main__":
    key = jax.random.PRNGKey(0)
    k_x, k_w, k_b, k_pos = jax.random.split(key, 4)

    # Shapes implied by the module: kernel=stride=8, num_patches=64 -> 64x64 in.
    B, C, H, W = 2, 3, 64, 64
    E, P = 384, 64

    x = jax.random.normal(k_x, (B, C, H, W), dtype=jnp.float32)

    fan_in = C * 8 * 8
    bound = 1.0 / jnp.sqrt(fan_in)
    conv_w = jax.random.uniform(k_w, (E, C, 8, 8), jnp.float32, -bound, bound)
    conv_b = jax.random.uniform(k_b, (E,), jnp.float32, -bound, bound)
    bn_gamma = jnp.ones((E,), jnp.float32)   # BatchNorm2d default init
    bn_beta = jnp.zeros((E,), jnp.float32)
    pos = jax.random.normal(k_pos, (1, P, E), dtype=jnp.float32)

    out = jax.block_until_ready(
        conv_patching_forward(x, conv_w, conv_b, bn_gamma, bn_beta, pos))
    assert out.shape == (B, P, E), out.shape

    # Tight check against a reference fed the same bf16-quantised matmul
    # operands (the deliberate perf trade-off); remaining diff is only
    # accumulation order / folded-affine rounding.
    xq = x.astype(jnp.bfloat16).astype(jnp.float32)
    wq = conv_w.astype(jnp.bfloat16).astype(jnp.float32)
    ref_q = jax.block_until_ready(
        _reference(xq, wq, conv_b, bn_gamma, bn_beta, pos))
    err_q = float(jnp.max(jnp.abs(out - ref_q)))
    assert err_q < 1e-3, err_q

    # Loose sanity check against the pure-f32 PyTorch-equivalent forward
    # (difference is only the bf16 quantisation of the matmul operands).
    ref_f = jax.block_until_ready(
        _reference(x, conv_w, conv_b, bn_gamma, bn_beta, pos))
    err_f = float(jnp.max(jnp.abs(out - ref_f)))
    assert err_f < 5e-2, err_f

    print("KERNEL_OK")
</pallas_src>

<mosaic_0001>
module attributes {stable_mosaic.version = 11 : i64} {
  func.func @_patch_bn_relu_pos_kernel(%arg0: i32, %arg1: memref<128x192xbf16, #tpu.memory_space<vmem>>, %arg2: memref<192x384xbf16, #tpu.memory_space<vmem>>, %arg3: memref<2x384xf32, #tpu.memory_space<vmem>>, %arg4: memref<64x384xf32, #tpu.memory_space<vmem>>, %arg5: memref<128x384xf32, #tpu.memory_space<vmem>>) attributes {dimension_semantics = [#tpu.dimension_semantics<arbitrary>], iteration_bounds = array<i64: 1>, scalar_prefetch = 0 : i64, scratch_operands = 0 : i64, tpu.core_type = #tpu.core_type<tc>, window_params = [{pipeline_mode = #tpu.pipeline_mode<synchronous>, transform_indices = @transform_0, window_bounds = array<i64: 128, 192>}, {pipeline_mode = #tpu.pipeline_mode<synchronous>, transform_indices = @transform_1, window_bounds = array<i64: 192, 384>}, {pipeline_mode = #tpu.pipeline_mode<synchronous>, transform_indices = @transform_2, window_bounds = array<i64: 2, 384>}, {pipeline_mode = #tpu.pipeline_mode<synchronous>, transform_indices = @transform_3, window_bounds = array<i64: 64, 384>}, {pipeline_mode = #tpu.pipeline_mode<synchronous>, transform_indices = @transform_4, window_bounds = array<i64: 128, 384>}]} {
    %c0 = arith.constant 0 : index
    %c0_0 = arith.constant 0 : index
    %0 = vector.load %arg1[%c0, %c0_0] : memref<128x192xbf16, #tpu.memory_space<vmem>>, vector<128x192xbf16>
    %c0_1 = arith.constant 0 : index
    %c0_2 = arith.constant 0 : index
    %1 = vector.load %arg2[%c0_1, %c0_2] : memref<192x384xbf16, #tpu.memory_space<vmem>>, vector<192x384xbf16>
    %cst = arith.constant dense<0.000000e+00> : vector<128x384xf32>
    %2 = tpu.matmul %0, %1, %cst {dimension_numbers = #tpu.dot_dimension_numbers<[1], [0], [0], [1], [0, 0, 1, 1], [], []>} : vector<128x192xbf16>, vector<192x384xbf16>, vector<128x384xf32> -> vector<128x384xf32>
    %cst_3 = arith.constant dense<0.000000e+00> : vector<384xf32>
    %3 = vector.multi_reduction <add>, %2, %cst_3 [0] : vector<128x384xf32> to vector<384xf32>
    %4 = vector.shape_cast %3 : vector<384xf32> to vector<1x384xf32>
    %5 = arith.mulf %2, %2 : vector<128x384xf32>
    %cst_4 = arith.constant dense<0.000000e+00> : vector<384xf32>
    %6 = vector.multi_reduction <add>, %5, %cst_4 [0] : vector<128x384xf32> to vector<384xf32>
    %7 = vector.shape_cast %6 : vector<384xf32> to vector<1x384xf32>
    %cst_5 = arith.constant 7.812500e-03 : f32
    %8 = vector.broadcast %cst_5 : f32 to vector<1x384xf32>
    %9 = arith.mulf %4, %8 : vector<1x384xf32>
    %cst_6 = arith.constant 7.812500e-03 : f32
    %10 = vector.broadcast %cst_6 : f32 to vector<1x384xf32>
    %11 = arith.mulf %7, %10 : vector<1x384xf32>
    %12 = arith.mulf %9, %9 : vector<1x384xf32>
    %13 = arith.subf %11, %12 : vector<1x384xf32>
    %cst_7 = arith.constant 0.000000e+00 : f32
    %14 = vector.broadcast %cst_7 : f32 to vector<1x384xf32>
    %15 = arith.maximumf %13, %14 : vector<1x384xf32>
    %c0_8 = arith.constant 0 : index
    %c0_9 = arith.constant 0 : index
    %16 = vector.load %arg3[%c0_8, %c0_9] : memref<2x384xf32, #tpu.memory_space<vmem>>, vector<1x384xf32>
    %c1 = arith.constant 1 : index
    %c0_10 = arith.constant 0 : index
    %17 = vector.load %arg3[%c1, %c0_10] : memref<2x384xf32, #tpu.memory_space<vmem>>, vector<1x384xf32>
    %cst_11 = arith.constant 9.99999974E-6 : f32
    %18 = vector.broadcast %cst_11 : f32 to vector<1x384xf32>
    %19 = arith.addf %15, %18 : vector<1x384xf32>
    %20 = math.rsqrt %19 : vector<1x384xf32>
    %21 = arith.mulf %16, %20 : vector<1x384xf32>
    %22 = arith.mulf %9, %21 : vector<1x384xf32>
    %23 = arith.subf %17, %22 : vector<1x384xf32>
    %24 = vector.broadcast %21 : vector<1x384xf32> to vector<128x384xf32>
    %25 = arith.mulf %2, %24 : vector<128x384xf32>
    %26 = vector.broadcast %23 : vector<1x384xf32> to vector<128x384xf32>
    %27 = arith.addf %25, %26 : vector<128x384xf32>
    %cst_12 = arith.constant 0.000000e+00 : f32
    %28 = vector.broadcast %cst_12 : f32 to vector<128x384xf32>
    %29 = arith.maximumf %27, %28 : vector<128x384xf32>
    %c0_13 = arith.constant 0 : index
    %c0_14 = arith.constant 0 : index
    %30 = vector.load %arg4[%c0_13, %c0_14] : memref<64x384xf32, #tpu.memory_space<vmem>>, vector<64x384xf32>
    %31 = vector.extract_strided_slice %29 {offsets = [0, 0], sizes = [64, 384], strides = [1, 1]} : vector<128x384xf32> to vector<64x384xf32>
    %32 = arith.addf %31, %30 : vector<64x384xf32>
    %c0_15 = arith.constant 0 : index
    %c0_16 = arith.constant 0 : index
    %33 = vector.load %arg5[%c0_15, %c0_16] : memref<128x384xf32, #tpu.memory_space<vmem>>, vector<64x384xf32>
    tpu.vector_store %arg5[%c0_15, %c0_16], %32 {strides = array<i32>} : memref<128x384xf32, #tpu.memory_space<vmem>>, vector<64x384xf32>,
    %34 = vector.extract_strided_slice %29 {offsets = [64, 0], sizes = [64, 384], strides = [1, 1]} : vector<128x384xf32> to vector<64x384xf32>
    %35 = arith.addf %34, %30 : vector<64x384xf32>
    %c64 = arith.constant 64 : index
    %c0_17 = arith.constant 0 : index
    %36 = vector.load %arg5[%c64, %c0_17] : memref<128x384xf32, #tpu.memory_space<vmem>>, vector<64x384xf32>
    tpu.vector_store %arg5[%c64, %c0_17], %35 {strides = array<i32>} : memref<128x384xf32, #tpu.memory_space<vmem>>, vector<64x384xf32>,
    return
  }
  func.func @transform_0(%arg0: i32) -> (i32, i32) {
    %c0_i32 = arith.constant 0 : i32
    %c0_i32_0 = arith.constant 0 : i32
    %c0_i32_1 = arith.constant 0 : i32
    return %c0_i32, %c0_i32_0 : i32, i32
  }
  func.func @transform_1(%arg0: i32) -> (i32, i32) {
    %c0_i32 = arith.constant 0 : i32
    %c0_i32_0 = arith.constant 0 : i32
    %c0_i32_1 = arith.constant 0 : i32
    return %c0_i32, %c0_i32_0 : i32, i32
  }
  func.func @transform_2(%arg0: i32) -> (i32, i32) {
    %c0_i32 = arith.constant 0 : i32
    %c0_i32_0 = arith.constant 0 : i32
    %c0_i32_1 = arith.constant 0 : i32
    return %c0_i32, %c0_i32_0 : i32, i32
  }
  func.func @transform_3(%arg0: i32) -> (i32, i32) {
    %c0_i32 = arith.constant 0 : i32
    %c0_i32_0 = arith.constant 0 : i32
    %c0_i32_1 = arith.constant 0 : i32
    return %c0_i32, %c0_i32_0 : i32, i32
  }
  func.func @transform_4(%arg0: i32) -> (i32, i32) {
    %c0_i32 = arith.constant 0 : i32
    %c0_i32_0 = arith.constant 0 : i32
    %c0_i32_1 = arith.constant 0 : i32
    return %c0_i32, %c0_i32_0 : i32, i32
  }
}

</mosaic_0001>

<bundles_post_ra>
// kernel: _forward_impl.1
= control target key start
LH: loop header
LB: loop body
LE: loop exit
PB: predicated region body
PF: predicated region fallthrough
CT: control target
= control target key end

     0   :  { %v1327_v1 = vmov 0   ;;  %vm347_vm0 = vcmask 523264   ;;  %s2280_s0 = inlined_call_operand.vmem [shape: bf16[128,192], index: 0, kind: input, shape index: {}]   ;;  %s2281_s1 = inlined_call_operand.vmem [shape: bf16[192,384], index: 1, kind: input, shape index: {}]   ;;  %s2282_s2 = inlined_call_operand.vmem [shape: f32[2,384], index: 2, kind: input, shape index: {}]   ;;  %s2283_s3 = inlined_call_operand.vmem [shape: f32[64,384], index: 3, kind: input, shape index: {}]   ;;  %s2284_s4 = inlined_call_operand.hbm [shape: f32[128,384], index: 4, kind: output, shape index: {}]  }
   0x1   :  { %v1225_v0 = vld [vmem:[%s2281_s1 + $0x4] ss:$12 sps:$4 sm:$0xff]   ;;  %485 = vmatprep.subr.bf16.mxu1 %v1327_v1  ;;  %v1227_v2 = vld [vmem:[%s2281_s1 + $0x8] ss:$12 sps:$4 sm:$0xff]   ;;  %v1228_v3 = vld [vmem:[%s2281_s1] ss:$12 sps:$4 sm:$0xff]  }
   0x2   :  { %372 = vmatprep.subr.bf16.mxu0 %v1225_v0  ;;  %486 = vmatpush1.bf16.msra.mxu1 %v1227_v2  ;;  %v1229_v4 = vld [vmem:[%s2281_s1 + $0x1c] ss:$12 sps:$4 sm:$0xff]   ;;  %v1231_v5 = vld [vmem:[%s2281_s1 + $0x20] ss:$12 sps:$4 sm:$0xff]   ;;  %v1232_v6 = vld [vmem:[%s2281_s1 + $0x18] ss:$12 sps:$4 sm:$0xff]  }
   0x3   :  { %373 = vmatpush1.bf16.msra.mxu0 %v1228_v3  ;;  %487 = vmatprep.subr.bf16.mxu1 %v1327_v1  ;;  %v1233_v7 = vld [vmem:[%s2281_s1 + $0x34] ss:$12 sps:$4 sm:$0xff]   ;;  %v1235_v8 = vld [vmem:[%s2281_s1 + $0x38] ss:$12 sps:$4 sm:$0xff]   ;;  %v1236_v9 = vld [vmem:[%s2281_s1 + $0x30] ss:$12 sps:$4 sm:$0xff]  }
   0x4   :  { %374 = vmatprep.subr.bf16.mxu0 %v1229_v4  ;;  %v1237_v10 = vld [vmem:[%s2281_s1 + $0x4c] ss:$12 sps:$4 sm:$0xff]   ;;  %v1239_v11 = vld [vmem:[%s2281_s1 + $0x50] ss:$12 sps:$4 sm:$0xff]   ;;  %v1240_v12 = vld [vmem:[%s2281_s1 + $0x48] ss:$12 sps:$4 sm:$0xff]  }
   0x5   :  { %v1241_v13 = vld [vmem:[%s2281_s1 + $0x64] ss:$12 sps:$4 sm:$0xff]   ;;  %v1243_v14 = vld [vmem:[%s2281_s1 + $0x68] ss:$12 sps:$4 sm:$0xff]   ;;  %v1244_v15 = vld [vmem:[%s2281_s1 + $0x60] ss:$12 sps:$4 sm:$0xff]  }
   0x6   :  { %488 = vmatpush1.bf16.msra.mxu1 %v1231_v5  ;;  %v1245_v16 = vld [vmem:[%s2281_s1 + $0x7c] ss:$12 sps:$4 sm:$0xff]   ;;  %v1247_v17 = vld [vmem:[%s2281_s1 + $0x80] ss:$12 sps:$4 sm:$0xff]   ;;  %v1248_v18 = vld [vmem:[%s2281_s1 + $0x78] ss:$12 sps:$4 sm:$0xff]  }
   0x7   :  { %375 = vmatpush1.bf16.msra.mxu0 %v1232_v6  ;;  %489 = vmatprep.subr.bf16.mxu1 %v1327_v1  ;;  %v1249_v19 = vld [vmem:[%s2281_s1 + $0x94] ss:$12 sps:$4 sm:$0xff]   ;;  %v1251_v20 = vld [vmem:[%s2281_s1 + $0x98] ss:$12 sps:$4 sm:$0xff]   ;;  %v1252_v21 = vld [vmem:[%s2281_s1 + $0x90] ss:$12 sps:$4 sm:$0xff]  }
   0x8   :  { %376 = vmatprep.subr.bf16.mxu0 %v1233_v7  ;;  %v1253_v22 = vld [vmem:[%s2281_s1 + $0xac] ss:$12 sps:$4 sm:$0xff]   ;;  %v1255_v23 = vld [vmem:[%s2281_s1 + $0xb0] ss:$12 sps:$4 sm:$0xff]   ;;  %v1256_v24 = vld [vmem:[%s2281_s1 + $0xa8] ss:$12 sps:$4 sm:$0xff]  }
   0x9   :  { %v1257_v25 = vld [vmem:[%s2281_s1 + $0xc4] ss:$12 sps:$4 sm:$0xff]   ;;  %v1259_v27 = vld [vmem:[%s2281_s1 + $0xc8] ss:$12 sps:$4 sm:$0xff]   ;;  %v1260_v28 = vld [vmem:[%s2281_s1 + $0xc0] ss:$12 sps:$4 sm:$0xff]  }
   0xa   :  { %490 = vmatpush1.bf16.msra.mxu1 %v1235_v8  ;;  %v1275_v26 = vld [vmem:[%s2280_s0 + $0x4] ss:$8 sps:$4 sm:$0xff]   ;;  %v1261_v29 = vld [vmem:[%s2281_s1 + $0xdc] ss:$12 sps:$4 sm:$0xff]   ;;  %v1265_v32 = vld [vmem:[%s2281_s1 + $0xf4] ss:$12 sps:$4 sm:$0xff]  }
   0xb   :  { %377 = vmatpush1.bf16.msra.mxu0 %v1236_v9  ;;  %491 = vmatprep.subr.bf16.mxu1 %v1327_v1  ;;  %v1263_v30 = vld [vmem:[%s2281_s1 + $0xe0] ss:$12 sps:$4 sm:$0xff]   ;;  %v1264_v31 = vld [vmem:[%s2281_s1 + $0xd8] ss:$12 sps:$4 sm:$0xff]  }
   0xc   :  { %378 = vmatprep.subr.bf16.mxu0 %v1237_v10  ;;  %1211 = vmatprep.mubr.msk.bf16.mxu1 %vm347_vm0, %v1275_v26 }
   0xd   :  { %1203 = vmatprep.mubr.msk.bf16.mxu0 %vm347_vm0, %v1275_v26 }
   0xe   :  { %492 = vmatpush1.bf16.msra.mxu1 %v1239_v11 }
   0xf   :  { %379 = vmatpush1.bf16.msra.mxu0 %v1240_v12  ;;  %493 = vmatprep.subr.bf16.mxu1 %v1327_v1 }
  0x10   :  { %380 = vmatprep.subr.bf16.mxu0 %v1241_v13 }
  0x12   :  { %494 = vmatpush1.bf16.msra.mxu1 %v1243_v14 }
  0x13   :  { %381 = vmatpush1.bf16.msra.mxu0 %v1244_v15  ;;  %495 = vmatprep.subr.bf16.mxu1 %v1327_v1 }
  0x14   :  { %382 = vmatprep.subr.bf16.mxu0 %v1245_v16 }
  0x16   :  { %496 = vmatpush1.bf16.msra.mxu1 %v1247_v17 }
  0x17   :  { %383 = vmatpush1.bf16.msra.mxu0 %v1248_v18  ;;  %497 = vmatprep.subr.bf16.mxu1 %v1327_v1 }
  0x18   :  { %384 = vmatprep.subr.bf16.mxu0 %v1249_v19 }
  0x1a   :  { %498 = vmatpush1.bf16.msra.mxu1 %v1251_v20 }
  0x1b   :  { %385 = vmatpush1.bf16.msra.mxu0 %v1252_v21  ;;  %499 = vmatprep.subr.bf16.mxu1 %v1327_v1 }
  0x1c   :  { %386 = vmatprep.subr.bf16.mxu0 %v1253_v22 }
  0x1e   :  { %500 = vmatpush1.bf16.msra.mxu1 %v1255_v23 }
  0x1f   :  { %387 = vmatpush1.bf16.msra.mxu0 %v1256_v24  ;;  %501 = vmatprep.subr.bf16.mxu1 %v1327_v1 }
  0x20   :  { %388 = vmatprep.subr.bf16.mxu0 %v1257_v25 }
  0x22   :  { %502 = vmatpush1.bf16.msra.mxu1 %v1259_v27 }
  0x23   :  { %389 = vmatpush1.bf16.msra.mxu0 %v1260_v28  ;;  %503 = vmatprep.subr.bf16.mxu1 %v1327_v1 }
  0x24   :  { %390 = vmatprep.subr.bf16.mxu0 %v1261_v29 }
  0x25   :  { %9 = vsyncpa [#allocation3], 0  ;;  %v1267_v33 = vld [vmem:[%s2281_s1 + $0xf8] ss:$12 sps:$4 sm:$0xff]   ;;  %v1268_v34 = vld [vmem:[%s2281_s1 + $0xf0] ss:$12 sps:$4 sm:$0xff]  }
  0x26   :  { %504 = vmatpush1.bf16.msra.mxu1 %v1263_v30  ;;  %v1269_v35 = vld [vmem:[%s2281_s1 + $0x10c] ss:$12 sps:$4 sm:$0xff]   ;;  %v1271_v36 = vld [vmem:[%s2281_s1 + $0x110] ss:$12 sps:$4 sm:$0xff]   ;;  %v1272_v37 = vld [vmem:[%s2281_s1 + $0x108] ss:$12 sps:$4 sm:$0xff]  }
  0x27   :  { %391 = vmatpush1.bf16.msra.mxu0 %v1264_v31  ;;  %505 = vmatprep.subr.bf16.mxu1 %v1327_v1  ;;  %v1273_v38 = vld [vmem:[%s2280_s0] ss:$8 sps:$4 sm:$0xff]   ;;  %v1276_v39 = vld [vmem:[%s2280_s0 + $0x14] ss:$8 sps:$4 sm:$0xff]   ;;  %v1278_v40 = vld [vmem:[%s2280_s0 + $0x10] ss:$8 sps:$4 sm:$0xff]  }
  0x28   :  { %392 = vmatprep.subr.bf16.mxu0 %v1265_v32  ;;  %v1279_v41 = vld [vmem:[%s2280_s0 + $0x24] ss:$8 sps:$4 sm:$0xff]   ;;  %v1281_v42 = vld [vmem:[%s2280_s0 + $0x20] ss:$8 sps:$4 sm:$0xff]   ;;  %v1282_v43 = vld [vmem:[%s2280_s0 + $0x34] ss:$8 sps:$4 sm:$0xff]  }
  0x29   :  { %v1284_v44 = vld [vmem:[%s2280_s0 + $0x30] ss:$8 sps:$4 sm:$0xff]   ;;  %v1285_v45 = vld [vmem:[%s2280_s0 + $0x44] ss:$8 sps:$4 sm:$0xff]   ;;  %v1287_v46 = vld [vmem:[%s2280_s0 + $0x40] ss:$8 sps:$4 sm:$0xff]  }
  0x2a   :  { %506 = vmatpush1.bf16.msra.mxu1 %v1267_v33  ;;  %v1288_v47 = vld [vmem:[%s2280_s0 + $0x54] ss:$8 sps:$4 sm:$0xff]   ;;  %v1290_v48 = vld [vmem:[%s2280_s0 + $0x50] ss:$8 sps:$4 sm:$0xff]   ;;  %v1291_v49 = vld [vmem:[%s2280_s0 + $0x64] ss:$8 sps:$4 sm:$0xff]  }
  0x2b   :  { %393 = vmatpush1.bf16.msra.mxu0 %v1268_v34  ;;  %507 = vmatprep.subr.bf16.mxu1 %v1327_v1  ;;  %v1293_v50 = vld [vmem:[%s2280_s0 + $0x60] ss:$8 sps:$4 sm:$0xff]   ;;  %v1294_v51 = vld [vmem:[%s2280_s0 + $0x74] ss:$8 sps:$4 sm:$0xff]   ;;  %v1296_v52 = vld [vmem:[%s2280_s0 + $0x70] ss:$8 sps:$4 sm:$0xff]  }
  0x2c   :  { %394 = vmatprep.subr.bf16.mxu0 %v1269_v35 }
  0x2e   :  { %508 = vmatpush1.bf16.msra.mxu1 %v1271_v36 }
  0x2f   :  { %395 = vmatpush1.bf16.msra.mxu0 %v1272_v37 }
  0x31   :  { %518 = vmatmul.mubr.bf16.vlgmr.msra.gmra.mrb[0].mxu1 %v1273_v38 }
  0x32   :  { %405 = vmatmul.mubr.bf16.vlgmr.msra.gmra.mrb[0].mxu0 %v1273_v38  ;;  %1212 = vmatprep.mubr.msk.bf16.mxu1 %vm347_vm0, %v1276_v39 }
  0x33   :  { %1204 = vmatprep.mubr.msk.bf16.mxu0 %vm347_vm0, %v1276_v39 }
  0x39   :  { %526 = vmatmul.mubr.bf16.gmra.mrb[4].mxu1 %v1278_v40 }
  0x3a   :  { %415 = vmatmul.mubr.bf16.gmra.mrb[4].mxu0 %v1278_v40  ;;  %1213 = vmatprep.mubr.msk.bf16.mxu1 %vm347_vm0, %v1279_v41 }
  0x3b   :  { %1205 = vmatprep.mubr.msk.bf16.mxu0 %vm347_vm0, %v1279_v41 }
  0x41   :  { %534 = vmatmul.mubr.bf16.gmra.mrb[8].mxu1 %v1281_v42 }
  0x42   :  { %425 = vmatmul.mubr.bf16.gmra.mrb[8].mxu0 %v1281_v42  ;;  %1214 = vmatprep.mubr.msk.bf16.mxu1 %vm347_vm0, %v1282_v43 }
  0x43   :  { %1206 = vmatprep.mubr.msk.bf16.mxu0 %vm347_vm0, %v1282_v43 }
  0x49   :  { %542 = vmatmul.mubr.bf16.gmra.mrb[12].mxu1 %v1284_v44 }
  0x4a   :  { %435 = vmatmul.mubr.bf16.gmra.mrb[12].mxu0 %v1284_v44  ;;  %1215 = vmatprep.mubr.msk.bf16.mxu1 %vm347_vm0, %v1285_v45 }
  0x4b   :  { %1207 = vmatprep.mubr.msk.bf16.mxu0 %vm347_vm0, %v1285_v45 }
  0x51   :  { %550 = vmatmul.mubr.bf16.gmra.mrb[16].mxu1 %v1287_v46 }
  0x52   :  { %445 = vmatmul.mubr.bf16.gmra.mrb[16].mxu0 %v1287_v46  ;;  %1216 = vmatprep.mubr.msk.bf16.mxu1 %vm347_vm0, %v1288_v47 }
  0x53   :  { %1208 = vmatprep.mubr.msk.bf16.mxu0 %vm347_vm0, %v1288_v47 }
  0x59   :  { %558 = vmatmul.mubr.bf16.gmra.mrb[20].mxu1 %v1290_v48 }
  0x5a   :  { %455 = vmatmul.mubr.bf16.gmra.mrb[20].mxu0 %v1290_v48  ;;  %1217 = vmatprep.mubr.msk.bf16.mxu1 %vm347_vm0, %v1291_v49 }
  0x5b   :  { %1209 = vmatprep.mubr.msk.bf16.mxu0 %vm347_vm0, %v1291_v49 }
  0x61   :  { %566 = vmatmul.mubr.bf16.gmra.mrb[24].mxu1 %v1293_v50 }
  0x62   :  { %465 = vmatmul.mubr.bf16.gmra.mrb[24].mxu0 %v1293_v50  ;;  %1218 = vmatprep.mubr.msk.bf16.mxu1 %vm347_vm0, %v1294_v51 }
  0x63   :  { %1210 = vmatprep.mubr.msk.bf16.mxu0 %vm347_vm0, %v1294_v51 }
  0x69   :  { %574 = vmatmul.mubr.bf16.gmra.mrb[28].mxu1 %v1296_v52 }
  0x6a   :  { %475 = vmatmul.mubr.bf16.gmra.mrb[28].mxu0 %v1296_v52 }
 0x104   :  { %v1541_v53 = vpop.f32.mrb[0].mxu1 }
 0x105   :  { %v1543_v54 = vpop.f32.mrb[0].mxu0  ;;  %v647_v55 = vmul.f32 %v1541_v53, %v1541_v53  ;;  %v521_v56 = vpop.f32.mrb[1].mxu1 }
 0x106   :  { %v1547_v57 = vpop.f32.mrb[1].mxu0  ;;  %v1549_v58 = vpop.f32.mrb[2].mxu1  ;;  %v645_v63 = vmul.f32 %v1543_v54, %v1543_v54 }
 0x107   :  { %v1551_v59 = vpop.f32.mrb[2].mxu0  ;;  %v624_v60 = vadd.f32 %v1549_v58, %v1541_v53  ;;  %v650_v61 = vmul.f32 %v1549_v58, %v1549_v58  ;;  %v524_v62 = vpop.f32.mrb[3].mxu1  ;;  %v646_v3 = vmul.f32 %v1547_v57, %v1547_v57 }
 0x108   :  { %v582_v0 = vadd.f32 %v1551_v59, %v1543_v54  ;;  %v648_v1 = vmul.f32 %v1551_v59, %v1551_v59  ;;  %v1563_v2 = vpop.f32.mrb[3].mxu0 }
 0x109   :  { %v735_v4 = vadd.f32 %v650_v61, %v647_v55  ;;  %v603_v5 = vadd.f32 %v1563_v2, %v1547_v57  ;;  %v649_v6 = vmul.f32 %v1563_v2, %v1563_v2 }
 0x10a   :  { %v693_v7 = vadd.f32 %v648_v1, %v645_v63 }
 0x10b   :  { %v714_v8 = vadd.f32 %v649_v6, %v646_v3 }
 0x10c   :  { %v1571_v9 = vpop.f32.mrb[4].mxu1 }
 0x10d   :  { %v625_v10 = vadd.f32 %v624_v60, %v1571_v9  ;;  %v653_v11 = vmul.f32 %v1571_v9, %v1571_v9  ;;  %v1576_v12 = vpop.f32.mrb[4].mxu0  ;;  %v529_v13 = vpop.f32.mrb[5].mxu1 }
 0x10e   :  { %v583_v14 = vadd.f32 %v582_v0, %v1576_v12  ;;  %v651_v15 = vmul.f32 %v1576_v12, %v1576_v12  ;;  %v1581_v16 = vpop.f32.mrb[5].mxu0  ;;  %v1583_v17 = vpop.f32.mrb[6].mxu1 }
 0x10f   :  { %v736_v18 = vadd.f32 %v735_v4, %v653_v11  ;;  %v604_v19 = vadd.f32 %v603_v5, %v1581_v16  ;;  %v652_v20 = vmul.f32 %v1581_v16, %v1581_v16  ;;  %v626_v21 = vadd.f32 %v625_v10, %v1583_v17  ;;  %v1589_v22 = vpop.f32.mrb[6].mxu0  ;;  %v532_v23 = vpop.f32.mrb[7].mxu1 }
 0x110   :  { %v694_v24 = vadd.f32 %v693_v7, %v651_v15  ;;  %v656_v25 = vmul.f32 %v1583_v17, %v1583_v17  ;;  %v584_v26 = vadd.f32 %v583_v14, %v1589_v22  ;;  %v654_v27 = vmul.f32 %v1589_v22, %v1589_v22  ;;  %v1596_v28 = vpop.f32.mrb[7].mxu0 }
 0x111   :  { %v715_v29 = vadd.f32 %v714_v8, %v652_v20  ;;  %v605_v30 = vadd.f32 %v604_v19, %v1596_v28  ;;  %v655_v31 = vmul.f32 %v1596_v28, %v1596_v28 }
 0x112   :  { %v737_v32 = vadd.f32 %v736_v18, %v656_v25  ;;  %v695_v33 = vadd.f32 %v694_v24, %v654_v27 }
 0x113   :  { %v716_v34 = vadd.f32 %v715_v29, %v655_v31 }
 0x114   :  { %v1601_v35 = vpop.f32.mrb[8].mxu1 }
 0x115   :  { %v627_v36 = vadd.f32 %v626_v21, %v1601_v35  ;;  %v659_v37 = vmul.f32 %v1601_v35, %v1601_v35  ;;  %v1606_v38 = vpop.f32.mrb[8].mxu0  ;;  %v537_v39 = vpop.f32.mrb[9].mxu1 }
 0x116   :  { %v585_v40 = vadd.f32 %v584_v26, %v1606_v38  ;;  %v657_v41 = vmul.f32 %v1606_v38, %v1606_v38  ;;  %v1611_v42 = vpop.f32.mrb[9].mxu0  ;;  %v1613_v43 = vpop.f32.mrb[10].mxu1 }
 0x117   :  { %v738_v44 = vadd.f32 %v737_v32, %v659_v37  ;;  %v606_v45 = vadd.f32 %v605_v30, %v1611_v42  ;;  %v658_v46 = vmul.f32 %v1611_v42, %v1611_v42  ;;  %v628_v47 = vadd.f32 %v627_v36, %v1613_v43  ;;  %v1619_v48 = vpop.f32.mrb[10].mxu0  ;;  %v540_v49 = vpop.f32.mrb[11].mxu1 }
 0x118   :  { %v696_v50 = vadd.f32 %v695_v33, %v657_v41  ;;  %v662_v51 = vmul.f32 %v1613_v43, %v1613_v43  ;;  %v586_v52 = vadd.f32 %v585_v40, %v1619_v48  ;;  %v660_v55 = vmul.f32 %v1619_v48, %v1619_v48  ;;  %v1626_v56 = vpop.f32.mrb[11].mxu0 }
 0x119   :  { %v717_v60 = vadd.f32 %v716_v34, %v658_v46  ;;  %v607_v61 = vadd.f32 %v606_v45, %v1626_v56  ;;  %v661_v62 = vmul.f32 %v1626_v56, %v1626_v56 }
 0x11a   :  { %v739_v63 = vadd.f32 %v738_v44, %v662_v51  ;;  %v697_v0 = vadd.f32 %v696_v50, %v660_v55 }
 0x11b   :  { %v718_v1 = vadd.f32 %v717_v60, %v661_v62 }
 0x11c   :  { %v1631_v3 = vpop.f32.mrb[12].mxu1 }
 0x11d   :  { %v629_v4 = vadd.f32 %v628_v47, %v1631_v3  ;;  %v665_v5 = vmul.f32 %v1631_v3, %v1631_v3  ;;  %v1636_v6 = vpop.f32.mrb[12].mxu0  ;;  %v545_v7 = vpop.f32.mrb[13].mxu1 }
 0x11e   :  { %v587_v8 = vadd.f32 %v586_v52, %v1636_v6  ;;  %v663_v10 = vmul.f32 %v1636_v6, %v1636_v6  ;;  %v1641_v11 = vpop.f32.mrb[13].mxu0  ;;  %v1643_v13 = vpop.f32.mrb[14].mxu1 }
 0x11f   :  { %v740_v14 = vadd.f32 %v739_v63, %v665_v5  ;;  %v608_v15 = vadd.f32 %v607_v61, %v1641_v11  ;;  %v664_v18 = vmul.f32 %v1641_v11, %v1641_v11  ;;  %v630_v19 = vadd.f32 %v629_v4, %v1643_v13  ;;  %v1649_v20 = vpop.f32.mrb[14].mxu0  ;;  %v548_v21 = vpop.f32.mrb[15].mxu1 }
 0x120   :  { %v698_v23 = vadd.f32 %v697_v0, %v663_v10  ;;  %v668_v24 = vmul.f32 %v1643_v13, %v1643_v13  ;;  %v588_v25 = vadd.f32 %v587_v8, %v1649_v20  ;;  %v666_v26 = vmul.f32 %v1649_v20, %v1649_v20  ;;  %v1656_v27 = vpop.f32.mrb[15].mxu0 }
 0x121   :  { %v719_v29 = vadd.f32 %v718_v1, %v664_v18  ;;  %v609_v30 = vadd.f32 %v608_v15, %v1656_v27  ;;  %v667_v31 = vmul.f32 %v1656_v27, %v1656_v27 }
 0x122   :  { %v741_v32 = vadd.f32 %v740_v14, %v668_v24  ;;  %v699_v33 = vadd.f32 %v698_v23, %v666_v26 }
 0x123   :  { %v720_v34 = vadd.f32 %v719_v29, %v667_v31 }
 0x124   :  { %v1661_v36 = vpop.f32.mrb[16].mxu1 }
 0x125   :  { %v631_v37 = vadd.f32 %v630_v19, %v1661_v36  ;;  %v671_v39 = vmul.f32 %v1661_v36, %v1661_v36  ;;  %v1666_v40 = vpop.f32.mrb[16].mxu0  ;;  %v553_v41 = vpop.f32.mrb[17].mxu1 }
 0x126   :  { %v589_v44 = vadd.f32 %v588_v25, %v1666_v40  ;;  %v669_v45 = vmul.f32 %v1666_v40, %v1666_v40  ;;  %v1671_v46 = vpop.f32.mrb[17].mxu0  ;;  %v1673_v47 = vpop.f32.mrb[18].mxu1 }
 0x127   :  { %v742_v49 = vadd.f32 %v741_v32, %v671_v39  ;;  %v610_v50 = vadd.f32 %v609_v30, %v1671_v46  ;;  %v670_v51 = vmul.f32 %v1671_v46, %v1671_v46  ;;  %v632_v52 = vadd.f32 %v631_v37, %v1673_v47  ;;  %v1679_v55 = vpop.f32.mrb[18].mxu0  ;;  %v556_v60 = vpop.f32.mrb[19].mxu1 }
 0x128   :  { %v700_v61 = vadd.f32 %v699_v33, %v669_v45  ;;  %v674_v62 = vmul.f32 %v1673_v47, %v1673_v47  ;;  %v590_v63 = vadd.f32 %v589_v44, %v1679_v55  ;;  %v672_v0 = vmul.f32 %v1679_v55, %v1679_v55  ;;  %v1686_v1 = vpop.f32.mrb[19].mxu0 }
 0x129   :  { %v721_v4 = vadd.f32 %v720_v34, %v670_v51  ;;  %v611_v5 = vadd.f32 %v610_v50, %v1686_v1  ;;  %v673_v7 = vmul.f32 %v1686_v1, %v1686_v1 }
 0x12a   :  { %v743_v8 = vadd.f32 %v742_v49, %v674_v62  ;;  %v701_v10 = vadd.f32 %v700_v61, %v672_v0 }
 0x12b   :  { %v722_v14 = vadd.f32 %v721_v4, %v673_v7 }
 0x12c   :  { %v1691_v15 = vpop.f32.mrb[20].mxu1 }
 0x12d   :  { %v633_v18 = vadd.f32 %v632_v52, %v1691_v15  ;;  %v677_v19 = vmul.f32 %v1691_v15, %v1691_v15  ;;  %v1696_v21 = vpop.f32.mrb[20].mxu0  ;;  %v561_v23 = vpop.f32.mrb[21].mxu1 }
 0x12e   :  { %v591_v24 = vadd.f32 %v590_v63, %v1696_v21  ;;  %v675_v25 = vmul.f32 %v1696_v21, %v1696_v21  ;;  %v1701_v26 = vpop.f32.mrb[21].mxu0  ;;  %v1703_v29 = vpop.f32.mrb[22].mxu1 }
 0x12f   :  { %2317 = vst [vmem:[#allocation5_spill] sm:$0xff] %v1703_v29  ;;  %v744_v30 = vadd.f32 %v743_v8, %v677_v19  ;;  %v612_v31 = vadd.f32 %v611_v5, %v1701_v26  ;;  %v676_v32 = vmul.f32 %v1701_v26, %v1701_v26  ;;  %v634_v33 = vadd.f32 %v633_v18, %v1703_v29  ;;  %v1709_v34 = vpop.f32.mrb[22].mxu0  ;;  %v564_v37 = vpop.f32.mrb[23].mxu1 }
 0x130   :  { %v702_v39 = vadd.f32 %v701_v10, %v675_v25  ;;  %v680_v41 = vmul.f32 %v1703_v29, %v1703_v29  ;;  %v592_v44 = vadd.f32 %v591_v24, %v1709_v34  ;;  %v678_v45 = vmul.f32 %v1709_v34, %v1709_v34  ;;  %v1716_v49 = vpop.f32.mrb[23].mxu0 }
 0x131   :  { %2318 = vst [vmem:[#allocation6_spill] sm:$0xff] %v1716_v49  ;;  %v723_v50 = vadd.f32 %v722_v14, %v676_v32  ;;  %v613_v51 = vadd.f32 %v612_v31, %v1716_v49  ;;  %v679_v52 = vmul.f32 %v1716_v49, %v1716_v49 }
 0x132   :  { %v745_v60 = vadd.f32 %v744_v30, %v680_v41  ;;  %v703_v61 = vadd.f32 %v702_v39, %v678_v45 }
 0x133   :  { %v724_v62 = vadd.f32 %v723_v50, %v679_v52 }
 0x134   :  { %v1721_v63 = vpop.f32.mrb[24].mxu1 }
 0x135   :  { %2319 = vst [vmem:[#allocation7_spill] sm:$0xff] %v1721_v63  ;;  %v635_v0 = vadd.f32 %v634_v33, %v1721_v63  ;;  %v683_v4 = vmul.f32 %v1721_v63, %v1721_v63  ;;  %v1726_v5 = vpop.f32.mrb[24].mxu0  ;;  %v569_v7 = vpop.f32.mrb[25].mxu1 }
 0x136   :  { %2320 = vst [vmem:[#allocation8_spill] sm:$0xff] %v1726_v5  ;;  %v593_v8 = vadd.f32 %v592_v44, %v1726_v5  ;;  %v681_v10 = vmul.f32 %v1726_v5, %v1726_v5  ;;  %v1731_v14 = vpop.f32.mrb[25].mxu0  ;;  %v1733_v18 = vpop.f32.mrb[26].mxu1 }
 0x137   :  { %2321 = vst [vmem:[#allocation9_spill] sm:$0xff] %v1731_v14  ;;  %2322 = vst [vmem:[#allocation10_spill] sm:$0xff] %v1733_v18  ;;  %v746_v19 = vadd.f32 %v745_v60, %v683_v4  ;;  %v614_v23 = vadd.f32 %v613_v51, %v1731_v14  ;;  %v682_v24 = vmul.f32 %v1731_v14, %v1731_v14  ;;  %v1739_v30 = vpop.f32.mrb[26].mxu0  ;;  %v572_v31 = vpop.f32.mrb[27].mxu1 }
 0x138   :  { %v636_v25 = vadd.f32 %v635_v0, %v1733_v18  ;;  %2323 = vst [vmem:[#allocation11_spill] sm:$0xff] %v1739_v30  ;;  %v704_v32 = vadd.f32 %v703_v61, %v681_v10  ;;  %v686_v33 = vmul.f32 %v1733_v18, %v1733_v18  ;;  %v594_v37 = vadd.f32 %v593_v8, %v1739_v30  ;;  %v1746_v41 = vpop.f32.mrb[27].mxu0 }
 0x139   :  { %v684_v39 = vmul.f32 %v1739_v30, %v1739_v30  ;;  %2324 = vst [vmem:[#allocation12_spill] sm:$0xff] %v1746_v41  ;;  %v725_v44 = vadd.f32 %v724_v62, %v682_v24  ;;  %v615_v45 = vadd.f32 %v614_v23, %v1746_v41  ;;  %v685_v50 = vmul.f32 %v1746_v41, %v1746_v41 }
 0x13a   :  { %v747_v51 = vadd.f32 %v746_v19, %v686_v33 }
 0x13b   :  { %v705_v52 = vadd.f32 %v704_v32, %v684_v39  ;;  %v726_v60 = vadd.f32 %v725_v44, %v685_v50 }
 0x13c   :  { %v1751_v61 = vpop.f32.mrb[28].mxu1 }
 0x13d   :  { %2325 = vst [vmem:[#allocation13_spill] sm:$0xff] %v1751_v61  ;;  %v637_v0 = vadd.f32 %v636_v25, %v1751_v61  ;;  %v689_v4 = vmul.f32 %v1751_v61, %v1751_v61  ;;  %v1756_v7 = vpop.f32.mrb[28].mxu0  ;;  %v577_v8 = vpop.f32.mrb[29].mxu1 }
 0x13e   :  { %2326 = vst [vmem:[#allocation14_spill] sm:$0xff] %v1756_v7  ;;  %v595_v62 = vadd.f32 %v594_v37, %v1756_v7  ;;  %v687_v10 = vmul.f32 %v1756_v7, %v1756_v7  ;;  %v1761_v23 = vpop.f32.mrb[29].mxu0  ;;  %v1763_v19 = vpop.f32.mrb[30].mxu1 }
 0x13f   :  { %2327 = vst [vmem:[#allocation15_spill] sm:$0xff] %v1761_v23  ;;  %2328 = vst [vmem:[#allocation16_spill] sm:$0xff] %v1763_v19  ;;  %v748_v24 = vadd.f32 %v747_v51, %v689_v4  ;;  %v616_v31 = vadd.f32 %v615_v45, %v1761_v23  ;;  %v688_v25 = vmul.f32 %v1761_v23, %v1761_v23  ;;  %v1769_v33 = vpop.f32.mrb[30].mxu0  ;;  %v580_v39 = vpop.f32.mrb[31].mxu1 }
 0x140   :  { %v638_v32 = vadd.f32 %v637_v0, %v1763_v19  ;;  %2329 = vst [vmem:[#allocation17_spill] sm:$0xff] %v1769_v33  ;;  %v706_v44 = vadd.f32 %v705_v52, %v687_v10  ;;  %v692_v37 = vmul.f32 %v1763_v19, %v1763_v19  ;;  %v596_v50 = vadd.f32 %v595_v62, %v1769_v33  ;;  %v1776_v51 = vpop.f32.mrb[31].mxu0 }
 0x141   :  { %v690_v8 = vmul.f32 %v1769_v33, %v1769_v33  ;;  %2330 = vst [vmem:[#allocation18_spill] sm:$0xff] %v1776_v51  ;;  %v727_v45 = vadd.f32 %v726_v60, %v688_v25  ;;  %v617_v61 = vadd.f32 %v616_v31, %v1776_v51  ;;  %v691_v0 = vmul.f32 %v1776_v51, %v1776_v51 }
 0x142   :  { %v639_v4 = vrot.slane %v638_v32, 4  ;;  %v749_v23 = vadd.f32 %v748_v24, %v692_v37  ;;  %v597_v39 = vrot.slane %v596_v50, 4 }
 0x143   :  { %v707_v52 = vadd.f32 %v706_v44, %v690_v8  ;;  %v618_v7 = vrot.slane %v617_v61, 4  ;;  %v728_v19 = vadd.f32 %v727_v45, %v691_v0 }
 0x144   :  { %v640_v10 = vadd.f32 %v639_v4, %v638_v32  ;;  %v750_v18 = vrot.slane %v749_v23, 4  ;;  %v598_v62 = vadd.f32 %v597_v39, %v596_v50 }
 0x145   :  { %v708_v41 = vrot.slane %v707_v52, 4  ;;  %v619_v33 = vadd.f32 %v618_v7, %v617_v61  ;;  %v729_v63 = vrot.slane %v728_v19, 4 }
 0x146   :  { %v641_v30 = vrot.slane %v640_v10, 2  ;;  %v751_v14 = vadd.f32 %v750_v18, %v749_v23  ;;  %v599_v60 = vrot.slane %v598_v62, 2 }
 0x147   :  { %v709_v25 = vadd.f32 %v708_v41, %v707_v52  ;;  %v620_v31 = vrot.slane %v619_v33, 2  ;;  %v730_v29 = vadd.f32 %v729_v63, %v728_v19 }
 0x148   :  { %v642_v5 = vadd.f32 %v641_v30, %v640_v10  ;;  %v752_v49 = vrot.slane %v751_v14, 2  ;;  %v600_v51 = vadd.f32 %v599_v60, %v598_v62 }
 0x149   :  { %v710_v24 = vrot.slane %v709_v25, 2  ;;  %v621_v44 = vadd.f32 %v620_v31, %v619_v33  ;;  %v731_v32 = vrot.slane %v730_v29, 2 }
 0x14a   :  { %v643_v37 = vrot.slane %v642_v5, 1  ;;  %v753_v8 = vadd.f32 %v752_v49, %v751_v14  ;;  %v601_v45 = vrot.slane %v600_v51, 1 }
 0x14b   :  { %v711_v4 = vadd.f32 %v710_v24, %v709_v25  ;;  %v622_v0 = vrot.slane %v621_v44, 1  ;;  %v732_v39 = vadd.f32 %v731_v32, %v730_v29 }
 0x14c   :  { %v644_v50 = vadd.f32 %v643_v37, %v642_v5  ;;  %v754_v61 = vrot.slane %v753_v8, 1  ;;  %v602_v7 = vadd.f32 %v601_v45, %v600_v51 }
 0x14d   :  { %v712_v18 = vrot.slane %v711_v4, 1  ;;  %v623_v41 = vadd.f32 %v622_v0, %v621_v44  ;;  %v733_v30 = vrot.slane %v732_v39, 1  ;;  %v787_v0 = vlaneseq }
 0x14e   :  { %v758_v23 = vmul.f32 0.0078125, %v644_v50  ;;  %v755_v52 = vadd.f32 %v754_v61, %v753_v8  ;;  %v756_v19 = vmul.f32 0.0078125, %v602_v7  ;;  %v1328_v8 = vmov 1966171168  }
 0x14f   :  { %v713_v63 = vadd.f32 %v712_v18, %v711_v4  ;;  %v734_v62 = vadd.f32 %v733_v30, %v732_v39  ;;  %v757_v60 = vmul.f32 0.0078125, %v623_v41  ;;  %v785_v4 = vunpack.c.l.s4 %v1328_v8 }
 0x150   :  { %v764_v10 = vmul.f32 %v758_v23, %v758_v23  ;;  %v761_v33 = vmul.f32 0.0078125, %v755_v52  ;;  %v762_v49 = vmul.f32 %v756_v19, %v756_v19  ;;  %v1781_v61 = vshrl.u32 %v787_v0, 7 }
 0x151   :  { %v759_v31 = vmul.f32 0.0078125, %v713_v63  ;;  %v760_v14 = vmul.f32 0.0078125, %v734_v62  ;;  %v763_v25 = vmul.f32 %v757_v60, %v757_v60  ;;  %v786_v39 = vunpack.c.0.s8 %v785_v4 }
 0x152   :  { %v767_v5 = vsub.f32 %v761_v33, %v764_v10  ;;  %v771_v33 = vld [vmem:[%s2282_s2] ss:$2 sm:$0x7] }
 0x153   :  { %v765_v24 = vsub.f32 %v759_v31, %v762_v49  ;;  %v766_v29 = vsub.f32 %v760_v14, %v763_v25  ;;  %v789_v41 = vsub.s32 %v786_v39, %v1781_v61  ;;  %v811_v49 = vsub.s32 0, %v1781_v61 }
 0x154   :  { %v770_v37 = vmax.f32 %v767_v5, 0.0  ;;  %v2300_v14 = vsub.s32 1, %v1781_v61  ;;  %v2299_v25 = vsub.s32 2, %v1781_v61 }
 0x155   :  { %v768_v51 = vmax.f32 %v765_v24, 0.0  ;;  %v769_v32 = vmax.f32 %v766_v29, 0.0 }
 0x156   :  { %v776_v45 = vadd.f32 1e-05, %v770_v37 }
 0x157   :  { %v774_v44 = vadd.f32 1e-05, %v768_v51  ;;  %v775_v50 = vadd.f32 1e-05, %v769_v32 }
 0x158   :  { %1297 = vrsqrt.f32 %v776_v45 }
 0x159   :  { %1299 = vrsqrt.f32 %v774_v44 }
 0x15a   :  { %1301 = vrsqrt.f32 %v775_v50 }
 0x162   :  { %v1298_v7 = vpop.eup %1297 }
 0x163   :  { %v1300_v18 = vpop.eup %1299  ;;  %v797_v63 = vrot.slane %v1298_v7, %v789_v41 }
 0x164   :  { %v1302_v30 = vpop.eup %1301 }
 0x165   :  { %v783_v52 = vcombine.low %v1300_v18, %v1302_v30 }
 0x167   :  { %v790_v10 = vrot.slane %v783_v52, %v789_v41 }
 0x169   :  { %v798_v62 = vcombine.low %v790_v10, %v797_v63 }
 0x16b   :  { %v805_v31 = vrot.slane %v798_v62, %v789_v41 }
 0x16d   :  { %v807_v5 = vmul.f32 %v805_v31, %v771_v33 }
 0x16f   :  { %v812_v24 = vrot.slane %v807_v5, %v811_v49  ;;  %v816_v29 = vrot.slane %v807_v5, %v2300_v14  ;;  %v820_v37 = vrot.slane %v807_v5, %v2299_v25  ;;  %v2343_v25 = vld [vmem:[#allocation18_spill] sm:$0xff]  ;;  %v2344_v14 = vld [vmem:[#allocation16_spill] sm:$0xff] }
 0x171   :  { %v824_v51 = vmul.f32 %v812_v24, %v756_v19  ;;  %v825_v32 = vmul.f32 %v816_v29, %v757_v60  ;;  %v826_v45 = vmul.f32 %v820_v37, %v758_v23  ;;  %v855_v44 = vmul.f32 %v812_v24, %v1543_v54 }
 0x172   :  { %v856_v50 = vmul.f32 %v816_v29, %v1547_v57  ;;  %v857_v8 = vmul.f32 %v820_v37, %v1541_v53  ;;  %v858_v4 = vmul.f32 %v812_v24, %v1551_v59  ;;  %v859_v0 = vmul.f32 %v816_v29, %v1563_v2 }
 0x173   :  { %v830_v39 = vcombine.low %v824_v51, %v825_v32  ;;  %v844_v7 = vrot.slane %v826_v45, %v789_v41  ;;  %v860_v18 = vmul.f32 %v820_v37, %v1549_v58  ;;  %v861_v30 = vmul.f32 %v812_v24, %v1576_v12 }
 0x174   :  { %v862_v19 = vmul.f32 %v816_v29, %v1581_v16  ;;  %v863_v23 = vmul.f32 %v820_v37, %v1571_v9  ;;  %v864_v54 = vmul.f32 %v812_v24, %v1589_v22  ;;  %v865_v57 = vmul.f32 %v816_v29, %v1596_v28 }
 0x175   :  { %v837_v60 = vrot.slane %v830_v39, %v789_v41  ;;  %v866_v53 = vmul.f32 %v820_v37, %v1583_v17  ;;  %v867_v59 = vmul.f32 %v812_v24, %v1606_v38  ;;  %v868_v2 = vmul.f32 %v816_v29, %v1611_v42  ;;  %v1219_v17 = vld [vmem:[%s2282_s2 + $0x1] ss:$2 sm:$0x7] }
 0x176   :  { %v869_v52 = vmul.f32 %v820_v37, %v1601_v35  ;;  %v870_v58 = vmul.f32 %v812_v24, %v1619_v48  ;;  %v871_v12 = vmul.f32 %v816_v29, %v1626_v56  ;;  %v872_v16 = vmul.f32 %v820_v37, %v1613_v43 }
 0x177   :  { %v845_v9 = vcombine.low %v837_v60, %v844_v7  ;;  %v873_v22 = vmul.f32 %v812_v24, %v1636_v6  ;;  %v874_v28 = vmul.f32 %v816_v29, %v1641_v11  ;;  %v875_v63 = vmul.f32 %v820_v37, %v1631_v3  ;;  %v2339_v60 = vld [vmem:[#allocation14_spill] sm:$0xff] }
 0x178   :  { %v876_v38 = vmul.f32 %v812_v24, %v1649_v20  ;;  %v877_v35 = vmul.f32 %v816_v29, %v1656_v27  ;;  %v878_v42 = vmul.f32 %v820_v37, %v1643_v13  ;;  %v879_v48 = vmul.f32 %v812_v24, %v1666_v40 }
 0x179   :  { %v852_v43 = vrot.slane %v845_v9, %v789_v41  ;;  %v880_v56 = vmul.f32 %v816_v29, %v1671_v46  ;;  %v881_v6 = vmul.f32 %v820_v37, %v1661_v36  ;;  %v882_v11 = vmul.f32 %v812_v24, %v1679_v55  ;;  %v2331_v41 = vld [vmem:[#allocation6_spill] sm:$0xff]  ;;  %v2332_v46 = vld [vmem:[#allocation5_spill] sm:$0xff]  ;;  %v2333_v36 = vld [vmem:[#allocation8_spill] sm:$0xff] }
 0x17a   :  { %v883_v3 = vmul.f32 %v816_v29, %v1686_v1  ;;  %v884_v10 = vmul.f32 %v820_v37, %v1673_v47  ;;  %v885_v62 = vmul.f32 %v812_v24, %v1696_v21  ;;  %v886_v20 = vmul.f32 %v816_v29, %v1701_v26  ;;  %v2334_v55 = vld [vmem:[#allocation9_spill] sm:$0xff]  ;;  %v2335_v1 = vld [vmem:[#allocation7_spill] sm:$0xff]  ;;  %v2337_v21 = vld [vmem:[#allocation12_spill] sm:$0xff] }
 0x17b   :  { %v854_v27 = vsub.f32 %v1219_v17, %v852_v43  ;;  %v887_v13 = vmul.f32 %v820_v37, %v1691_v15  ;;  %v888_v40 = vmul.f32 %v812_v24, %v1709_v34  ;;  %v889_v33 = vmul.f32 %v816_v29, %v2331_v41  ;;  %v2336_v47 = vld [vmem:[#allocation11_spill] sm:$0xff]  ;;  %v2338_v26 = vld [vmem:[#allocation10_spill] sm:$0xff]  ;;  %v2341_v17 = vld [vmem:[#allocation13_spill] sm:$0xff] }
 0x17c   :  { %v890_v31 = vmul.f32 %v820_v37, %v2332_v46  ;;  %v891_v5 = vmul.f32 %v812_v24, %v2333_v36  ;;  %v892_v51 = vmul.f32 %v816_v29, %v2334_v55  ;;  %v893_v32 = vmul.f32 %v820_v37, %v2335_v1  ;;  %v2340_v9 = vld [vmem:[#allocation15_spill] sm:$0xff]  ;;  %v2342_v41 = vld [vmem:[#allocation17_spill] sm:$0xff] }
 0x17d   :  { %v894_v45 = vmul.f32 %v812_v24, %v2336_v47  ;;  %v895_v39 = vmul.f32 %v816_v29, %v2337_v21  ;;  %v896_v7 = vmul.f32 %v820_v37, %v2338_v26  ;;  %v897_v15 = vmul.f32 %v812_v24, %v2339_v60 }
 0x17e   :  { %v898_v34 = vmul.f32 %v816_v29, %v2340_v9  ;;  %v899_v43 = vmul.f32 %v820_v37, %v2341_v17  ;;  %v900_v46 = vmul.f32 %v812_v24, %v2342_v41  ;;  %v901_v36 = vmul.f32 %v816_v29, %v2343_v25 }
 0x17f   :  { %v902_v55 = vmul.f32 %v820_v37, %v2344_v14  ;;  %v907_v1 = vrot.slane %v854_v27, %v811_v49  ;;  %v2345_v47 = vsub.s32 1, %v1781_v61  ;;  %v2346_v26 = vsub.s32 2, %v1781_v61 }
 0x181   :  { %v911_v21 = vrot.slane %v854_v27, %v2345_v47  ;;  %v915_v60 = vrot.slane %v854_v27, %v2346_v26  ;;  %v1853_v9 = vadd.f32 %v907_v1, %v855_v44  ;;  %v1859_v41 = vadd.f32 %v907_v1, %v858_v4  ;;  %v2008_v26 = vld [vmem:[%s2283_s3 + $0x20] sm:$0xff]  ;;  %v2013_v47 = vld [vmem:[%s2283_s3 + $0x28] sm:$0xff] }
 0x182   :  { %v1865_v29 = vadd.f32 %v907_v1, %v861_v30  ;;  %v1871_v61 = vadd.f32 %v907_v1, %v864_v54  ;;  %v1937_v27 = vadd.f32 %v907_v1, %v897_v15  ;;  %v2080_v15 = vld [vmem:[%s2283_s3 + $0x80] sm:$0xff] }
 0x183   :  { %v1855_v17 = vadd.f32 %v911_v21, %v856_v50  ;;  %v1857_v24 = vadd.f32 %v915_v60, %v857_v8  ;;  %v1861_v25 = vadd.f32 %v911_v21, %v859_v0  ;;  %v1863_v14 = vadd.f32 %v915_v60, %v860_v18 }
 0x184   :  { %v1867_v49 = vadd.f32 %v911_v21, %v862_v19  ;;  %v1869_v37 = vadd.f32 %v915_v60, %v863_v23  ;;  %v1873_v44 = vadd.f32 %v911_v21, %v865_v57  ;;  %v1875_v50 = vadd.f32 %v915_v60, %v866_v53  ;;  %2357 = vst [vmem:[#allocation13_spill] sm:$0xff] %v1937_v27 }
 0x185   :  { %v1877_v8 = vadd.f32 %v907_v1, %v867_v59  ;;  %v1879_v4 = vadd.f32 %v911_v21, %v868_v2  ;;  %v1881_v0 = vadd.f32 %v915_v60, %v869_v52  ;;  %v1883_v18 = vadd.f32 %v907_v1, %v870_v58 }
 0x186   :  { %v1885_v30 = vadd.f32 %v911_v21, %v871_v12  ;;  %v1887_v19 = vadd.f32 %v915_v60, %v872_v16  ;;  %v1889_v23 = vadd.f32 %v907_v1, %v873_v22  ;;  %v1891_v54 = vadd.f32 %v911_v21, %v874_v28 }
 0x187   :  { %v1893_v57 = vadd.f32 %v915_v60, %v875_v63  ;;  %v1895_v53 = vadd.f32 %v907_v1, %v876_v38  ;;  %v1897_v59 = vadd.f32 %v911_v21, %v877_v35  ;;  %v1899_v2 = vadd.f32 %v915_v60, %v878_v42 }
 0x188   :  { %v1901_v52 = vadd.f32 %v907_v1, %v879_v48  ;;  %v1903_v58 = vadd.f32 %v911_v21, %v880_v56  ;;  %v1905_v12 = vadd.f32 %v915_v60, %v881_v6  ;;  %v1907_v16 = vadd.f32 %v907_v1, %v882_v11 }
 0x189   :  { %v1909_v22 = vadd.f32 %v911_v21, %v883_v3  ;;  %v1911_v28 = vadd.f32 %v915_v60, %v884_v10  ;;  %v1913_v63 = vadd.f32 %v907_v1, %v885_v62  ;;  %v1915_v38 = vadd.f32 %v911_v21, %v886_v20 }
 0x18a   :  { %v1917_v35 = vadd.f32 %v915_v60, %v887_v13  ;;  %v1919_v42 = vadd.f32 %v907_v1, %v888_v40  ;;  %v1921_v48 = vadd.f32 %v911_v21, %v889_v33  ;;  %v1923_v56 = vadd.f32 %v915_v60, %v890_v31 }
 0x18b   :  { %v1925_v6 = vadd.f32 %v907_v1, %v891_v5  ;;  %v1927_v11 = vadd.f32 %v911_v21, %v892_v51  ;;  %v1929_v3 = vadd.f32 %v915_v60, %v893_v32  ;;  %v1931_v10 = vadd.f32 %v907_v1, %v894_v45  ;;  %v2037_v45 = vld [vmem:[%s2283_s3 + $0x48] sm:$0xff]  ;;  %v2051_v51 = vld [vmem:[%s2283_s3 + $0x58] sm:$0xff] }
 0x18c   :  { %2347 = vst [vmem:[#allocation6_spill] sm:$0xff] %v1917_v35  ;;  %2348 = vst [vmem:[#allocation5_spill] sm:$0xff] %v1919_v42  ;;  %v1933_v62 = vadd.f32 %v911_v21, %v895_v39  ;;  %v1935_v20 = vadd.f32 %v915_v60, %v896_v7  ;;  %v1939_v13 = vadd.f32 %v911_v21, %v898_v34  ;;  %v2032_v39 = vld [vmem:[%s2283_s3 + $0x40] sm:$0xff]  ;;  %v2042_v34 = vld [vmem:[%s2283_s3 + $0x50] sm:$0xff]  ;;  %v2374_v42 = vmax.f32 %v1875_v50, 0.0 }
 0x18d   :  { %2349 = vst [vmem:[#allocation8_spill] sm:$0xff] %v1921_v48  ;;  %2350 = vst [vmem:[#allocation9_spill] sm:$0xff] %v1923_v56  ;;  %v1941_v40 = vadd.f32 %v915_v60, %v899_v43  ;;  %v1943_v33 = vadd.f32 %v907_v1, %v900_v46  ;;  %v1945_v31 = vadd.f32 %v911_v21, %v901_v36  ;;  %v1984_v21 = vld [vmem:[%s2283_s3] sm:$0xff]  ;;  %v1994_v46 = vld [vmem:[%s2283_s3 + $0x10] sm:$0xff]  ;;  %v2363_v36 = vmax.f32 %v1853_v9, 0.0 }
 0x18e   :  { %2351 = vst [vmem:[#allocation7_spill] sm:$0xff] %v1925_v6  ;;  %2352 = vst [vmem:[#allocation11_spill] sm:$0xff] %v1927_v11  ;;  %v1947_v5 = vadd.f32 %v915_v60, %v902_v55  ;;  %v1989_v60 = vld [vmem:[%s2283_s3 + $0x8] sm:$0xff]  ;;  %v1999_v55 = vld [vmem:[%s2283_s3 + $0x18] sm:$0xff]  ;;  %v2370_v6 = vmax.f32 %v1867_v49, 0.0  ;;  %v1050_v35 = vadd.f32 %v2051_v51, %v2374_v42  ;;  %v2378_v50 = vmax.f32 %v1883_v18, 0.0 }
 0x18f   :  { %2353 = vst [vmem:[#allocation12_spill] sm:$0xff] %v1929_v3  ;;  %2354 = vst [vmem:[#allocation10_spill] sm:$0xff] %v1931_v10  ;;  %v2018_v1 = vld [vmem:[%s2283_s3 + $0x30] sm:$0xff]  ;;  %v2023_v43 = vld [vmem:[%s2283_s3 + $0x38] sm:$0xff]  ;;  %v2382_v18 = vmax.f32 %v1891_v54, 0.0  ;;  %v2386_v54 = vmax.f32 %v1899_v2, 0.0 }
 0x190   :  { %2355 = vst [vmem:[#allocation14_spill] sm:$0xff] %v1933_v62  ;;  %2356 = vst [vmem:[#allocation15_spill] sm:$0xff] %v1935_v20  ;;  %v2056_v10 = vld [vmem:[%s2283_s3 + $0x60] sm:$0xff]  ;;  %v2065_v32 = vld [vmem:[%s2283_s3 + $0x68] sm:$0xff]  ;;  %v2366_v20 = vmax.f32 %v1859_v41, 0.0  ;;  %v1046_v56 = vadd.f32 %v2023_v43, %v2370_v6  ;;  %v2372_v6 = vmax.f32 %v1871_v61, 0.0 }
 0x191   :  { %2358 = vst [vmem:[#allocation17_spill] sm:$0xff] %v1939_v13  ;;  %2359 = vst [vmem:[#allocation18_spill] sm:$0xff] %v1941_v40  ;;  %v2070_v13 = vld [vmem:[%s2283_s3 + $0x70] sm:$0xff]  ;;  %v2075_v3 = vld [vmem:[%s2283_s3 + $0x78] sm:$0xff]  ;;  %v2365_v40 = vmax.f32 %v1857_v24, 0.0  ;;  %v2367_v24 = vmax.f32 %v1861_v25, 0.0 }
 0x192   :  { %2360 = vst [vmem:[#allocation16_spill] sm:$0xff] %v1943_v33  ;;  %2361 = vst [vmem:[#allocation19_spill] sm:$0xff] %v1945_v31  ;;  %v2085_v7 = vld [vmem:[%s2283_s3 + $0x88] sm:$0xff]  ;;  %v2364_v31 = vmax.f32 %v1855_v17, 0.0  ;;  %v1042_v62 = vadd.f32 %v1999_v55, %v2366_v20  ;;  %v2102_v11 = vld [vmem:[%s2283_s3 + $0x90] sm:$0xff]  ;;  %v2368_v20 = vmax.f32 %v1863_v14, 0.0  ;;  %v1054_v42 = vadd.f32 %v2075_v3, %v2378_v50 }
 0x193   :  { %2362 = vst [vmem:[#allocation20_spill] sm:$0xff] %v1947_v5  ;;  %v1039_v5 = vadd.f32 %v1984_v21, %v2363_v36  ;;  %v1041_v27 = vadd.f32 %v1994_v46, %v2365_v40  ;;  %v2107_v9 = vld [vmem:[%s2283_s3 + $0x98] sm:$0xff]  ;;  %v2112_v17 = vld [vmem:[%s2283_s3 + $0xa0] sm:$0xff]  ;;  %v1043_v41 = vadd.f32 %v2008_v26, %v2367_v24  ;;  %v2129_v48 = vld [vmem:[%s2283_s3 + $0xa8] sm:$0xff]  ;;  %v1048_v24 = vadd.f32 %v2037_v45, %v2372_v6 }
 0x194   :  { %v1040_v33 = vadd.f32 %v1989_v60, %v2364_v31  ;;  %v1044_v40 = vadd.f32 %v2013_v47, %v2368_v20  ;;  %v2369_v31 = vmax.f32 %v1865_v29, 0.0  ;;  %v2134_v25 = vld [vmem:[%s2283_s3 + $0xb0] sm:$0xff]  ;;  %v2139_v14 = vld [vmem:[%s2283_s3 + $0xb8] sm:$0xff]  ;;  %v2371_v29 = vmax.f32 %v1869_v37, 0.0  ;;  %1066 = vst [vmem:[#allocation2 + $0x18] sm:$0xff] %v1042_v62  ;;  %1070 = vst [vmem:[#allocation2 + $0x38] sm:$0xff] %v1046_v56 }
 0x195   :  { %v2373_v20 = vmax.f32 %v1873_v44, 0.0  ;;  %1063 = vst [vmem:[#allocation2] sm:$0xff] %v1039_v5  ;;  %1065 = vst [vmem:[#allocation2 + $0x10] sm:$0xff] %v1041_v27  ;;  %v2375_v37 = vmax.f32 %v1877_v8, 0.0  ;;  %v2376_v61 = vmax.f32 %v1879_v4, 0.0  ;;  %v2377_v44 = vmax.f32 %v1881_v0, 0.0 }
 0x196   :  { %v1045_v36 = vadd.f32 %v2018_v1, %v2369_v31  ;;  %v1047_v49 = vadd.f32 %v2032_v39, %v2371_v29  ;;  %1064 = vst [vmem:[#allocation2 + $0x8] sm:$0xff] %v1040_v33  ;;  %1067 = vst [vmem:[#allocation2 + $0x20] sm:$0xff] %v1043_v41  ;;  %v2379_v8 = vmax.f32 %v1885_v30, 0.0  ;;  %v2380_v4 = vmax.f32 %v1887_v19, 0.0  ;;  %s1329_s3 = smov [#allocation2]   ;;  %v2405_v50 = vld [vmem:[#allocation11_spill] sm:$0xff] }
 0x197   :  { %v1049_v31 = vadd.f32 %v2042_v34, %v2373_v20  ;;  %v1051_v29 = vadd.f32 %v2056_v10, %v2375_v37  ;;  %v1052_v6 = vadd.f32 %v2065_v32, %v2376_v61  ;;  %v1053_v20 = vadd.f32 %v2070_v13, %v2377_v44  ;;  %1068 = vst [vmem:[#allocation2 + $0x28] sm:$0xff] %v1044_v40  ;;  %s1140_s8 = sshll.u32 %s1329_s3, 4  ;;  %v2395_v37 = vld [vmem:[#allocation6_spill] sm:$0xff]  ;;  %v2397_v61 = vld [vmem:[#allocation5_spill] sm:$0xff]  ;;  %s2249_s8 = int_to_ptr.vmem [resolvable:$true] %s1140_s8 }
 0x198   :  { %1069 = vst [vmem:[#allocation2 + $0x30] sm:$0xff] %v1045_v36  ;;  %v1055_v62 = vadd.f32 %v2080_v15, %v2379_v8  ;;  %v1056_v27 = vadd.f32 %v2085_v7, %v2380_v4  ;;  %v2381_v0 = vmax.f32 %v1889_v23, 0.0  ;;  %v1058_v5 = vadd.f32 %v2107_v9, %v2382_v18  ;;  %1071 = vst [vmem:[#allocation2 + $0x40] sm:$0xff] %v1047_v49  ;;  %v2401_v44 = vld [vmem:[#allocation9_spill] sm:$0xff]  ;;  %v2407_v8 = vld [vmem:[#allocation12_spill] sm:$0xff]  ;;  %s1303_s9 = scalar_lea.vmem %s2249_s8, 6144  ;;  %p1308_p1 = scmp.lt.s32.totalorder %s2249_s8, %s2249_s8 }
 0x199   :  { %1072 = vst [vmem:[#allocation2 + $0x48] sm:$0xff] %v1048_v24  ;;  %1073 = vst [vmem:[#allocation2 + $0x50] sm:$0xff] %v1049_v31  ;;  %v2383_v30 = vmax.f32 %v1893_v57, 0.0  ;;  %v2384_v19 = vmax.f32 %v1895_v53, 0.0  ;;  %v2385_v23 = vmax.f32 %v1897_v59, 0.0  ;;  %v1062_v36 = vadd.f32 %v2139_v14, %v2386_v54  ;;  %v2409_v4 = vld [vmem:[#allocation10_spill] sm:$0xff]  ;;  %p1304_p0 = scmp.ne.s32.totalorder %s2249_s8, %s1303_s9  ;;  %p1309_p2 = scmp.lt.s32.totalorder %s1303_s9, %s1303_s9 }
 0x19a   :  { %v1057_v33 = vadd.f32 %v2102_v11, %v2381_v0  ;;  %1074 = vst [vmem:[#allocation2 + $0x58] sm:$0xff] %v1050_v35  ;;  %1075 = vst [vmem:[#allocation2 + $0x60] sm:$0xff] %v1051_v29  ;;  %v2387_v57 = vmax.f32 %v1901_v52, 0.0  ;;  %v2388_v59 = vmax.f32 %v1903_v58, 0.0  ;;  %v2389_v2 = vmax.f32 %v1905_v12, 0.0  ;;  %v2411_v0 = vld [vmem:[#allocation14_spill] sm:$0xff] }
 0x19b   :  { %v1059_v56 = vadd.f32 %v2112_v17, %v2383_v30  ;;  %v1060_v41 = vadd.f32 %v2129_v48, %v2384_v19  ;;  %v1061_v40 = vadd.f32 %v2134_v25, %v2385_v23  ;;  %1076 = vst [vmem:[#allocation2 + $0x68] sm:$0xff] %v1052_v6  ;;  %1077 = vst [vmem:[#allocation2 + $0x70] sm:$0xff] %v1053_v20  ;;  %v2390_v24 = vmax.f32 %v1907_v16, 0.0  ;;  %v2399_v6 = vld [vmem:[#allocation8_spill] sm:$0xff]  ;;  %v2413_v18 = vld [vmem:[#allocation15_spill] sm:$0xff]  ;;  %p1310_p3 = por %p1309_p2, %p1308_p1 }
 0x19c   :  { %1078 = vst [vmem:[#allocation2 + $0x78] sm:$0xff] %v1054_v42  ;;  %1079 = vst [vmem:[#allocation2 + $0x80] sm:$0xff] %v1055_v62  ;;  %v1087_v53 = vadd.f32 %v1984_v21, %v2387_v57  ;;  %v1088_v35 = vadd.f32 %v1989_v60, %v2388_v59  ;;  %v1089_v49 = vadd.f32 %v1994_v46, %v2389_v2  ;;  %v2391_v52 = vmax.f32 %v1909_v22, 0.0  ;;  %v2415_v30 = vld [vmem:[#allocation13_spill] sm:$0xff]  ;;  %v2419_v23 = vld [vmem:[#allocation18_spill] sm:$0xff] }
 0x19d   :  { %1080 = vst [vmem:[#allocation2 + $0x88] sm:$0xff] %v1056_v27  ;;  %1081 = vst [vmem:[#allocation2 + $0x90] sm:$0xff] %v1057_v33  ;;  %v1090_v31 = vadd.f32 %v1999_v55, %v2390_v24  ;;  %v2392_v58 = vmax.f32 %v1911_v28, 0.0  ;;  %v2393_v12 = vmax.f32 %v1913_v63, 0.0  ;;  %v2394_v16 = vmax.f32 %v1915_v38, 0.0  ;;  %v2417_v19 = vld [vmem:[#allocation17_spill] sm:$0xff]  ;;  %p1311_p4 = pnand %p1310_p3, %p1304_p0 }
 0x19e   :  { %1082 = vst [vmem:[#allocation2 + $0x98] sm:$0xff] %v1058_v5  ;;  %1083 = vst [vmem:[#allocation2 + $0xa0] sm:$0xff] %v1059_v56  ;;  %v1091_v21 = vadd.f32 %v2008_v26, %v2391_v52  ;;  %v2396_v29 = vmax.f32 %v2395_v37, 0.0  ;;  %v2398_v26 = vmax.f32 %v2397_v61, 0.0  ;;  %v2406_v42 = vmax.f32 %v2405_v50, 0.0  ;;  %v2421_v54 = vld [vmem:[#allocation16_spill] sm:$0xff] }
 0x19f   :  { %1084 = vst [vmem:[#allocation2 + $0xa8] sm:$0xff] %v1060_v41  ;;  %1085 = vst [vmem:[#allocation2 + $0xb0] sm:$0xff] %v1061_v40  ;;  %v1092_v60 = vadd.f32 %v2013_v47, %v2392_v58  ;;  %v1093_v46 = vadd.f32 %v2018_v1, %v2393_v12  ;;  %v1094_v55 = vadd.f32 %v2023_v43, %v2394_v16  ;;  %v2400_v47 = vmax.f32 %v2399_v6, 0.0  ;;  %v2403_v43 = vld [vmem:[#allocation7_spill] sm:$0xff] }
 0x1a0   :  { %1086 = vst [vmem:[#allocation2 + $0xb8] sm:$0xff] %v1062_v36  ;;  %v1095_v22 = vadd.f32 %v2032_v39, %v2396_v29  ;;  %v1096_v28 = vadd.f32 %v2037_v45, %v2398_v26  ;;  %v2402_v1 = vmax.f32 %v2401_v44, 0.0  ;;  %1111 = vst [vmem:[#allocation2 + $0xc0] sm:$0xff] %v1087_v53  ;;  %v2404_v20 = vmax.f32 %v2403_v43, 0.0  ;;  %v2425_v53 = vld [vmem:[#allocation20_spill] sm:$0xff] }
 0x1a1   :  { %v1097_v63 = vadd.f32 %v2042_v34, %v2400_v47  ;;  %1112 = vst [vmem:[#allocation2 + $0xc8] sm:$0xff] %v1088_v35  ;;  %1113 = vst [vmem:[#allocation2 + $0xd0] sm:$0xff] %v1089_v49  ;;  %v1100_v45 = vadd.f32 %v2065_v32, %v2406_v42  ;;  %v2408_v62 = vmax.f32 %v2407_v8, 0.0  ;;  %v2410_v27 = vmax.f32 %v2409_v4, 0.0 }
 0x1a2   :  { %v1098_v38 = vadd.f32 %v2051_v51, %v2402_v1  ;;  %1114 = vst [vmem:[#allocation2 + $0xd8] sm:$0xff] %v1090_v31  ;;  %v1099_v39 = vadd.f32 %v2056_v10, %v2404_v20  ;;  %1115 = vst [vmem:[#allocation2 + $0xe0] sm:$0xff] %v1091_v21  ;;  %v2412_v33 = vmax.f32 %v2411_v0, 0.0  ;;  %v2414_v5 = vmax.f32 %v2413_v18, 0.0 }
 0x1a3   :  { %v1101_v34 = vadd.f32 %v2070_v13, %v2408_v62  ;;  %v1102_v51 = vadd.f32 %v2075_v3, %v2410_v27  ;;  %1116 = vst [vmem:[#allocation2 + $0xe8] sm:$0xff] %v1092_v60  ;;  %1117 = vst [vmem:[#allocation2 + $0xf0] sm:$0xff] %v1093_v46  ;;  %v2416_v56 = vmax.f32 %v2415_v30, 0.0  ;;  %v2418_v41 = vmax.f32 %v2417_v19, 0.0 }
 0x1a4   :  { %1118 = vst [vmem:[#allocation2 + $0xf8] sm:$0xff] %v1094_v55  ;;  %v1103_v10 = vadd.f32 %v2080_v15, %v2412_v33  ;;  %v1104_v32 = vadd.f32 %v2085_v7, %v2414_v5  ;;  %1119 = vst [vmem:[#allocation2 + $0x100] sm:$0xff] %v1095_v22  ;;  %v2420_v15 = vmax.f32 %v2419_v23, 0.0  ;;  %v2422_v7 = vmax.f32 %v2421_v54, 0.0 }
 0x1a5   :  { %v1105_v13 = vadd.f32 %v2102_v11, %v2416_v56  ;;  %v1106_v3 = vadd.f32 %v2107_v9, %v2418_v41  ;;  %1120 = vst [vmem:[#allocation2 + $0x108] sm:$0xff] %v1096_v28  ;;  %1121 = vst [vmem:[#allocation2 + $0x110] sm:$0xff] %v1097_v63  ;;  %v2423_v11 = vld [vmem:[#allocation19_spill] sm:$0xff]  ;;  %v2426_v59 = vmax.f32 %v2425_v53, 0.0 }
 0x1a6   :  { %1122 = vst [vmem:[#allocation2 + $0x118] sm:$0xff] %v1098_v38  ;;  %v1107_v40 = vadd.f32 %v2112_v17, %v2420_v15  ;;  %v1108_v36 = vadd.f32 %v2129_v48, %v2422_v7  ;;  %v2424_v57 = vmax.f32 %v2423_v11, 0.0  ;;  %1123 = vst [vmem:[#allocation2 + $0x120] sm:$0xff] %v1099_v39 }
 0x1a7   :  { %v1110_v35 = vadd.f32 %v2139_v14, %v2426_v59  ;;  %1124 = vst [vmem:[#allocation2 + $0x128] sm:$0xff] %v1100_v45  ;;  %1125 = vst [vmem:[#allocation2 + $0x130] sm:$0xff] %v1101_v34 }
 0x1a8   :  { %v1109_v9 = vadd.f32 %v2134_v25, %v2424_v57  ;;  %1126 = vst [vmem:[#allocation2 + $0x138] sm:$0xff] %v1102_v51  ;;  %1127 = vst [vmem:[#allocation2 + $0x140] sm:$0xff] %v1103_v10 }
 0x1a9   :  { %1128 = vst [vmem:[#allocation2 + $0x148] sm:$0xff] %v1104_v32  ;;  %1129 = vst [vmem:[#allocation2 + $0x150] sm:$0xff] %v1105_v13 }
 0x1aa   :  { %1130 = vst [vmem:[#allocation2 + $0x158] sm:$0xff] %v1106_v3  ;;  %1131 = vst [vmem:[#allocation2 + $0x160] sm:$0xff] %v1107_v40 }
 0x1ab   :  { %1132 = vst [vmem:[#allocation2 + $0x168] sm:$0xff] %v1108_v36  ;;  %1133 = vst [vmem:[#allocation2 + $0x170] sm:$0xff] %v1109_v9 }
 0x1ac   :  { %1134 = vst [vmem:[#allocation2 + $0x178] sm:$0xff] %v1110_v35 }
 0x1ad   :  { %1314 = shalt.err (!%p1311_p4)
}
 0x1ae   :  { %s1315_s12 = scalar_lea.hbm %s2284_s4, 6144 }
 0x1af   :  { %p1316_p5 = scmp.ne.s32.totalorder %s2284_s4, %s1315_s12  ;;  %p1319_p6 = scmp.lt.u32.totalorder %s1315_s12, %s2284_s4 }
 0x1b1   :  { %p1321_p7 = pnand %p1319_p6, %p1316_p5 }
 0x1b3   :  { %1324 = shalt.err (!%p1321_p7)
}
 0x1b4   :  { %s1330_s16 = smov 384   ;;  %s1331_s2 = smov 24  }
 0x1b5   :  { %1146 = dma.vmem_to_hbm [thread:$0]  %s2249_s8, 6144, %s2284_s4, [#allocation3], %s1330_s16, %s1330_s16, %s1331_s2  }
 0x1b6   :  { %1325 = dma.done.wait [#allocation3], 6144  }
 0x1b7   :  { %1326 = vsyncadd [#allocation3], 4294961152 }
 0x1b8   :  { %1150 = vsyncpa [#allocation3], 1 }

</bundles_post_ra>
